<compile_context>
chip_gen: v6e
topology: v6e:2x2x1
jax: 0.10.0
libtpu: 0.0.40
codegen_flags: <defaults>
</compile_context>

<pallas_src>
import functools

import jax
import jax.numpy as jnp
from jax.experimental import pallas as pl
from jax.experimental.pallas import tpu as pltpu


def encoder_kernel(x_ref, w_mu_ref, w_std_ref, b_mu_ref, b_std_ref, noise_ref,
                   out_ref, *, laten_size, mxu_dtype):
    x = x_ref[...]                                  # [TB, R]
    w_mu = w_mu_ref[...]                            # [R, L]
    w_std = w_std_ref[...]                          # [R, L]
    if mxu_dtype is not None:
        x = x.astype(mxu_dtype)
        w_mu = w_mu.astype(mxu_dtype)
        w_std = w_std.astype(mxu_dtype)

    # Two clean MXU dots (same total K*N work as one [R, 2L] dot) -> no
    # sub-128-lane slice of the matmul result.  f32 accumulation.
    pre_mu = jnp.dot(x, w_mu, preferred_element_type=jnp.float32) + b_mu_ref[...]
    pre_st = jnp.dot(x, w_std, preferred_element_type=jnp.float32) + b_std_ref[...]

    # LeakyReLU(0.2) in f32 on the VPU.
    mus = jnp.where(pre_mu >= 0, pre_mu, 0.2 * pre_mu)
    pre_st = jnp.where(pre_st >= 0, pre_st, 0.2 * pre_st)
    stds = jax.nn.sigmoid(pre_st)                   # EUP
    z = noise_ref[...] * stds + mus                 # reparameterization

    L = laten_size
    out_ref[:, 0:L] = mus.astype(out_ref.dtype)
    out_ref[:, L:2 * L] = stds.astype(out_ref.dtype)
    out_ref[:, 2 * L:3 * L] = z.astype(out_ref.dtype)


def _pick_batch_tile(B, R, L, itemsize=4, pipeline_budget_bytes=24 * 1024 * 1024):
    """Largest power-of-two multiple of 8 batch tile that fits the double
    buffered pipeline budget (conservative enough for v7x's 64 MiB VMEM)."""
    if B <= 8:
        return B
    tb = 8
    while tb * 2 <= min(B, 1024):
        cand = tb * 2
        # x + noise + fused out, double-buffered.
        per_step = 2 * (cand * R + cand * L + cand * 3 * L) * itemsize
        if per_step <= pipeline_budget_bytes:
            tb = cand
        else:
            break
    return tb


def encoder_forward(x, w_t, b, noise, laten_size, *, block_b=None,
                    mxu_dtype=None):
    """x: [B, resSize], w_t: [resSize, 2*latenSize] (transposed torch weight),
    b: [2*latenSize], noise: [B, latenSize] standard-normal samples.
    Returns (mus, stds, z), each [B, latenSize] float32."""
    B, R = x.shape
    L = laten_size
    assert w_t.shape == (R, 2 * L)
    assert noise.shape == (B, L)

    # Split the weight/bias into the mu- and std-producing halves so the
    # kernel never slices the matmul output at a non-128-aligned lane offset.
    w_mu = w_t[:, :L]
    w_std = w_t[:, L:]
    b_mu = b[:L].reshape(1, L)
    b_std = b[L:].reshape(1, L)

    if block_b is None:
        block_b = _pick_batch_tile(B, R, L)
    block_b = min(block_b, B)
    # (8,128) rule: a batch block smaller than B must be a multiple of 8.
    if block_b != B and block_b % 8 != 0:
        block_b = max(8, (block_b // 8) * 8)

    grid = (pl.cdiv(B, block_b),)

    # Explicit scoped-VMEM limit: at least the 32 MiB default, never above
    # v7x's 64 MiB physical VMEM.
    itemsize = 4
    per_step = 2 * (block_b * R + block_b * L + block_b * 3 * L) * itemsize
    resident = 2 * (2 * R * L + 2 * L) * itemsize
    vmem_bytes = min(max(per_step + resident + (4 << 20), 32 << 20), 64 << 20)

    kernel = functools.partial(encoder_kernel, laten_size=L,
                               mxu_dtype=mxu_dtype)

    out = pl.pallas_call(
        kernel,
        out_shape=jax.ShapeDtypeStruct((B, 3 * L), jnp.float32),
        grid=grid,
        in_specs=[
            pl.BlockSpec((block_b, R), lambda i: (i, 0)),   # x   (batch tiled)
            pl.BlockSpec((R, L), lambda i: (0, 0)),         # W_mu (resident)
            pl.BlockSpec((R, L), lambda i: (0, 0)),         # W_std (resident)
            pl.BlockSpec((1, L), lambda i: (0, 0)),         # b_mu
            pl.BlockSpec((1, L), lambda i: (0, 0)),         # b_std
            pl.BlockSpec((block_b, L), lambda i: (i, 0)),   # noise (batch tiled)
        ],
        out_specs=pl.BlockSpec((block_b, 3 * L), lambda i: (i, 0)),
        compiler_params=pltpu.CompilerParams(
            dimension_semantics=("parallel",),
            vmem_limit_bytes=int(vmem_bytes),
        ),
    )(x, w_mu, w_std, b_mu, b_std, noise)

    mus = out[:, :L]
    stds = out[:, L:2 * L]
    z = out[:, 2 * L:]
    return mus, stds, z


def reference_forward(x, w_t, b, noise, laten_size):
    latent = x @ w_t + b
    latent = jnp.where(latent >= 0, latent, 0.2 * latent)
    mus = latent[:, :laten_size]
    stds = jax.nn.sigmoid(latent[:, laten_size:])
    z = noise * stds + mus
    return mus, stds, z


if __name__ == "__main__":
    # Small synthetic config: opt.resSize = 64, opt.latenSize = 32, batch = 32.
    # block_b=8 forces a 4-step pipelined grid even at these toy shapes.
    res_size = 64
    laten_size = 32
    batch = 32

    key = jax.random.PRNGKey(0)
    k_x, k_w, k_n = jax.random.split(key, 3)

    # weights_init: Linear.weight ~ N(0, 0.02), Linear.bias = 0.
    # PyTorch weight is [2L, R]; we store its transpose [R, 2L].
    w_t = jax.random.normal(k_w, (res_size, 2 * laten_size), jnp.float32) * 0.02
    b = jnp.zeros((2 * laten_size,), jnp.float32)

    x = jax.random.normal(k_x, (batch, res_size), jnp.float32)
    noise = jax.random.normal(k_n, (batch, laten_size), jnp.float32)

    # f32 MXU inputs here for exact comparison; pass mxu_dtype=jnp.bfloat16
    # for production shapes on v6e/v7x.
    mus, stds, z = encoder_forward(x, w_t, b, noise, laten_size, block_b=8)
    jax.block_until_ready((mus, stds, z))

    # Sanity check against a pure-JAX reference.
    r_mus, r_stds, r_z = reference_forward(x, w_t, b, noise, laten_size)
    assert jnp.allclose(mus, r_mus, atol=1e-5, rtol=1e-5)
    assert jnp.allclose(stds, r_stds, atol=1e-5, rtol=1e-5)
    assert jnp.allclose(z, r_z, atol=1e-5, rtol=1e-5)

    print("KERNEL_OK")
</pallas_src>

<mosaic_0001>
module attributes {stable_mosaic.version = 11 : i64} {
  func.func @encoder_kernel(%arg0: i32, %arg1: memref<8x64xf32, #tpu.memory_space<vmem>>, %arg2: memref<64x32xf32, #tpu.memory_space<vmem>>, %arg3: memref<64x32xf32, #tpu.memory_space<vmem>>, %arg4: memref<1x32xf32, #tpu.memory_space<vmem>>, %arg5: memref<1x32xf32, #tpu.memory_space<vmem>>, %arg6: memref<8x32xf32, #tpu.memory_space<vmem>>, %arg7: memref<8x96xf32, #tpu.memory_space<vmem>>) attributes {dimension_semantics = [#tpu.dimension_semantics<parallel>], iteration_bounds = array<i64: 4>, scalar_prefetch = 0 : i64, scratch_operands = 0 : i64, tpu.core_type = #tpu.core_type<tc>, window_params = [{transform_indices = @transform_0, window_bounds = array<i64: 8, 64>}, {pipeline_mode = #tpu.pipeline_mode<synchronous>, transform_indices = @transform_1, window_bounds = array<i64: 64, 32>}, {pipeline_mode = #tpu.pipeline_mode<synchronous>, transform_indices = @transform_2, window_bounds = array<i64: 64, 32>}, {pipeline_mode = #tpu.pipeline_mode<synchronous>, transform_indices = @transform_3, window_bounds = array<i64: 1, 32>}, {pipeline_mode = #tpu.pipeline_mode<synchronous>, transform_indices = @transform_4, window_bounds = array<i64: 1, 32>}, {transform_indices = @transform_5, window_bounds = array<i64: 8, 32>}, {transform_indices = @transform_6, window_bounds = array<i64: 8, 96>}]} {
    %c0 = arith.constant 0 : index
    %c0_0 = arith.constant 0 : index
    %0 = vector.load %arg1[%c0, %c0_0] : memref<8x64xf32, #tpu.memory_space<vmem>>, vector<8x64xf32>
    %c0_1 = arith.constant 0 : index
    %c0_2 = arith.constant 0 : index
    %1 = vector.load %arg2[%c0_1, %c0_2] : memref<64x32xf32, #tpu.memory_space<vmem>>, vector<64x32xf32>
    %c0_3 = arith.constant 0 : index
    %c0_4 = arith.constant 0 : index
    %2 = vector.load %arg3[%c0_3, %c0_4] : memref<64x32xf32, #tpu.memory_space<vmem>>, vector<64x32xf32>
    %cst = arith.constant dense<0.000000e+00> : vector<8x32xf32>
    %3 = tpu.matmul %0, %1, %cst {dimension_numbers = #tpu.dot_dimension_numbers<[1], [0], [0], [1], [0, 0, 1, 1], [], []>} : vector<8x64xf32>, vector<64x32xf32>, vector<8x32xf32> -> vector<8x32xf32>
    %c0_5 = arith.constant 0 : index
    %c0_6 = arith.constant 0 : index
    %4 = vector.load %arg4[%c0_5, %c0_6] : memref<1x32xf32, #tpu.memory_space<vmem>>, vector<1x32xf32>
    %5 = vector.broadcast %4 : vector<1x32xf32> to vector<8x32xf32>
    %6 = arith.addf %3, %5 : vector<8x32xf32>
    %cst_7 = arith.constant dense<0.000000e+00> : vector<8x32xf32>
    %7 = tpu.matmul %0, %2, %cst_7 {dimension_numbers = #tpu.dot_dimension_numbers<[1], [0], [0], [1], [0, 0, 1, 1], [], []>} : vector<8x64xf32>, vector<64x32xf32>, vector<8x32xf32> -> vector<8x32xf32>
    %c0_8 = arith.constant 0 : index
    %c0_9 = arith.constant 0 : index
    %8 = vector.load %arg5[%c0_8, %c0_9] : memref<1x32xf32, #tpu.memory_space<vmem>>, vector<1x32xf32>
    %9 = vector.broadcast %8 : vector<1x32xf32> to vector<8x32xf32>
    %10 = arith.addf %7, %9 : vector<8x32xf32>
    %cst_10 = arith.constant 0.000000e+00 : f32
    %11 = vector.broadcast %cst_10 : f32 to vector<8x32xf32>
    %12 = arith.cmpf oge, %6, %11 : vector<8x32xf32>
    %cst_11 = arith.constant 2.000000e-01 : f32
    %13 = vector.broadcast %cst_11 : f32 to vector<8x32xf32>
    %14 = arith.mulf %13, %6 : vector<8x32xf32>
    %15 = arith.select %12, %6, %14 : vector<8x32xi1>, vector<8x32xf32>
    %cst_12 = arith.constant 0.000000e+00 : f32
    %16 = vector.broadcast %cst_12 : f32 to vector<8x32xf32>
    %17 = arith.cmpf oge, %10, %16 : vector<8x32xf32>
    %cst_13 = arith.constant 2.000000e-01 : f32
    %18 = vector.broadcast %cst_13 : f32 to vector<8x32xf32>
    %19 = arith.mulf %18, %10 : vector<8x32xf32>
    %20 = arith.select %17, %10, %19 : vector<8x32xi1>, vector<8x32xf32>
    %21 = arith.negf %20 : vector<8x32xf32>
    %22 = math.exp %21 : vector<8x32xf32>
    %cst_14 = arith.constant 1.000000e+00 : f32
    %23 = vector.broadcast %cst_14 : f32 to vector<8x32xf32>
    %24 = arith.addf %23, %22 : vector<8x32xf32>
    %25 = arith.divf %23, %24 : vector<8x32xf32>
    %c0_15 = arith.constant 0 : index
    %c0_16 = arith.constant 0 : index
    %26 = vector.load %arg6[%c0_15, %c0_16] : memref<8x32xf32, #tpu.memory_space<vmem>>, vector<8x32xf32>
    %27 = arith.mulf %26, %25 : vector<8x32xf32>
    %28 = arith.addf %27, %15 : vector<8x32xf32>
    %c0_17 = arith.constant 0 : index
    %c0_18 = arith.constant 0 : index
    %29 = vector.load %arg7[%c0_17, %c0_18] : memref<8x96xf32, #tpu.memory_space<vmem>>, vector<8x32xf32>
    tpu.vector_store %arg7[%c0_17, %c0_18], %15 {strides = array<i32>} : memref<8x96xf32, #tpu.memory_space<vmem>>, vector<8x32xf32>,
    %c0_19 = arith.constant 0 : index
    %c32 = arith.constant 32 : index
    %30 = vector.load %arg7[%c0_19, %c32] : memref<8x96xf32, #tpu.memory_space<vmem>>, vector<8x32xf32>
    tpu.vector_store %arg7[%c0_19, %c32], %25 {strides = array<i32>} : memref<8x96xf32, #tpu.memory_space<vmem>>, vector<8x32xf32>,
    %c0_20 = arith.constant 0 : index
    %c64 = arith.constant 64 : index
    %31 = vector.load %arg7[%c0_20, %c64] : memref<8x96xf32, #tpu.memory_space<vmem>>, vector<8x32xf32>
    tpu.vector_store %arg7[%c0_20, %c64], %28 {strides = array<i32>} : memref<8x96xf32, #tpu.memory_space<vmem>>, vector<8x32xf32>,
    return
  }
  func.func @transform_0(%arg0: i32) -> (i32, i32) {
    %c0_i32 = arith.constant 0 : i32
    %c0_i32_0 = arith.constant 0 : i32
    return %arg0, %c0_i32 : i32, i32
  }
  func.func @transform_1(%arg0: i32) -> (i32, i32) {
    %c0_i32 = arith.constant 0 : i32
    %c0_i32_0 = arith.constant 0 : i32
    %c0_i32_1 = arith.constant 0 : i32
    return %c0_i32, %c0_i32_0 : i32, i32
  }
  func.func @transform_2(%arg0: i32) -> (i32, i32) {
    %c0_i32 = arith.constant 0 : i32
    %c0_i32_0 = arith.constant 0 : i32
    %c0_i32_1 = arith.constant 0 : i32
    return %c0_i32, %c0_i32_0 : i32, i32
  }
  func.func @transform_3(%arg0: i32) -> (i32, i32) {
    %c0_i32 = arith.constant 0 : i32
    %c0_i32_0 = arith.constant 0 : i32
    %c0_i32_1 = arith.constant 0 : i32
    return %c0_i32, %c0_i32_0 : i32, i32
  }
  func.func @transform_4(%arg0: i32) -> (i32, i32) {
    %c0_i32 = arith.constant 0 : i32
    %c0_i32_0 = arith.constant 0 : i32
    %c0_i32_1 = arith.constant 0 : i32
    return %c0_i32, %c0_i32_0 : i32, i32
  }
  func.func @transform_5(%arg0: i32) -> (i32, i32) {
    %c0_i32 = arith.constant 0 : i32
    %c0_i32_0 = arith.constant 0 : i32
    return %arg0, %c0_i32 : i32, i32
  }
  func.func @transform_6(%arg0: i32) -> (i32, i32) {
    %c0_i32 = arith.constant 0 : i32
    %c0_i32_0 = arith.constant 0 : i32
    return %arg0, %c0_i32 : i32, i32
  }
}

</mosaic_0001>

<bundles_post_ra>
// kernel: tpu_custom_call.1
= control target key start
LH: loop header
LB: loop body
LE: loop exit
PB: predicated region body
PF: predicated region fallthrough
CT: control target
= control target key end

     0   :  { %11 = vsyncpa [#allocation3], 0  ;;  %s939_s0 = inlined_call_operand.vmem [shape: f32[32,64], index: 0, kind: input, shape index: {}]   ;;  %s940_s1 = inlined_call_operand.vmem [shape: f32[64,32], index: 1, kind: input, shape index: {}]   ;;  %s941_s2 = inlined_call_operand.vmem [shape: f32[64,32], index: 2, kind: input, shape index: {}]   ;;  %s942_s3 = inlined_call_operand.vmem [shape: f32[1,32], index: 3, kind: input, shape index: {}]   ;;  %s943_s4 = inlined_call_operand.vmem [shape: f32[1,32], index: 4, kind: input, shape index: {}]   ;;  %s944_s5 = inlined_call_operand.vmem [shape: f32[32,32], index: 5, kind: input, shape index: {}]   ;;  %s945_s6 = inlined_call_operand.hbm [shape: f32[32,96], index: 6, kind: output, shape index: {}]  }
   0x1   :  { %13 = vsyncpa [#allocation3 + $0x1], 0  ;;  %s774_s21 = smov 0   ;;  %s776_s22 = smov 0  }
   0x2   :  { %s778_s23 = smov 0   ;;  %s780_s24 = smov 0  }
   0x3 LB: > { %s795_s25 = sadd.s32 4294967295, %s732_s24   ;;  %s553_s26 = sadd.s32 4294967294, %s732_s24   ;;  %s732_s24 = sphi %s780_s24, %s951_s24   ;;  %s728_s23 = sphi %s778_s23, %s950_s23   ;;  %s724_s22 = sphi %s776_s22, %s949_s22   ;;  %s720_s21 = sphi %s774_s21, %s948_s21  }
   0x4   : > { %s799_s27 = sadd.s32 1, %s732_s24   ;;  %s162_s28 = sadd.s32 1, %s728_s23 }
   0x5   : > { %s159_s29 = ssub.s32 %s732_s24, %s799_s27  ;;  %p172_p0 = scmp.ne.s32.totalorder %s728_s23, %s724_s22 }
   0x6   : > { %p160_p1 = scmp.eq.s32.totalorder %s159_s29, 0  ;;  %p173_p2 = scmp.eq.s32.totalorder %s795_s25, 3 }
   0x7   : > { %p178_p3 = scmp.ne.s32.totalorder %s724_s22, %s720_s21  ;;  %p179_p4 = scmp.eq.s32.totalorder %s553_s26, 3 }
   0x8   : > { %s810_s30 = scalar_select %p160_p1, %s728_s23, %s162_s28  }
   0x9   : > { %p812_p5 = por %p173_p2, %p172_p0  ;;  %p816_p6 = por %p179_p4, %p178_p3 }
   0xa   : > { %p556_p7 = scmp.ge.s32.totalorder %s732_s24, 1  ;;  %p223_p8 = scmp.lt.s32.totalorder %s732_s24, 5 }
   0xc   : > { %p224_p9 = pnand %p556_p7, %p223_p8 }
   0xd   : > { %p256_p10 = scmp.lt.s32.totalorder (!%p224_p9), %s795_s25, 3  ;;  %s253_s26 = sand.u32 (!%p224_p9), 1, %s724_s22  }
   0xe   : > { %227 = sbr.rel (%p224_p9) target bundleno = 398 (0x18e), region = 44  ;;  %s557_s9 = sshll.u32 (!%p224_p9), %s253_s26, 3 }
   0xf   : > { %s736_s15 = smov (!%p224_p9), 32   ;;  %s737_s16 = smov (!%p224_p9), 64  }
  0x10   : > { %s566_s17 = sshll.u32 (!%p224_p9), %s795_s25, 7  ;;  %s469_s28 = scalar_lea.sflag (!%p224_p9), [#allocation3], %s253_s26 }
  0x13   : > { %v280_v0 = vld [vmem:[%s941_s2 + $0x38] sm:$0xff]  ;;  %v734_v1 = vmov 0.0   ;;  %v279_v2 = vld [vmem:[%s941_s2 + $0x30] sm:$0xff]  ;;  %vm735_vm0 = vmmov 0   ;;  %v278_v4 = vld [vmem:[%s941_s2 + $0x28] sm:$0xff]  ;;  %s842_s19 = scalar_select %p256_p10, %s795_s25, 3 }
  0x14   : > { %606 = vmatprep.subr.mxu1 %v734_v1  ;;  %622 = vmatprep.mubr.msk.f32.mxu1 %vm735_vm0, %v734_v1  ;;  %v272_v3 = vld [vmem:[%s940_s1 + $0x38] sm:$0xff]  ;;  %v271_v5 = vld [vmem:[%s940_s1 + $0x30] sm:$0xff]  ;;  %v270_v6 = vld [vmem:[%s940_s1 + $0x28] sm:$0xff]  ;;  %vm288_vm1 = vcmask 523264   ;;  %vm454_vm4 = vcmask 261120   ;;  %vm460_vm5 = vcmask 523520  }
  0x15   : > { %607 = vmatpush3.msra.mxu1 %v280_v0  ;;  %587 = vmatprep.subr.mxu0 %v734_v1  ;;  %v277_v7 = vld [vmem:[%s941_s2 + $0x20] sm:$0xff]  ;;  %v276_v9 = vld [vmem:[%s941_s2 + $0x18] sm:$0xff]  ;;  %s558_s13 = sshll.u32 %s842_s19, 3  ;;  %v275_v11 = vld [vmem:[%s941_s2 + $0x10] sm:$0xff]  ;;  %vm466_vm6 = vcmask 785920  }
  0x16   : > { %608 = vmatprep.subr.mxu1 %v734_v1  ;;  %588 = vmatpush3.msra.mxu0 %v272_v3  ;;  %v269_v8 = vld [vmem:[%s940_s1 + $0x20] sm:$0xff]  ;;  %v268_v10 = vld [vmem:[%s940_s1 + $0x18] sm:$0xff]  ;;  %v267_v12 = vld [vmem:[%s940_s1 + $0x10] sm:$0xff]  ;;  %s259_s10 = scalar_lea.vmem %s939_s0, %s558_s13  ;;  %s263_s14 = scalar_lea.vmem %s944_s5, %s558_s13 }
  0x17   : > { %609 = vmatpush3.msra.mxu1 %v279_v2  ;;  %589 = vmatprep.subr.mxu0 %v734_v1  ;;  %v274_v13 = vld [vmem:[%s941_s2 + $0x8] sm:$0xff]  ;;  %v273_v15 = vld [vmem:[%s941_s2] sm:$0xff]  ;;  %s902_s13 = scalar_lea.hbm %s945_s6, %s566_s17 }
  0x18   : > { %610 = vmatprep.subr.mxu1 %v734_v1  ;;  %590 = vmatpush3.msra.mxu0 %v271_v5  ;;  %v266_v14 = vld [vmem:[%s940_s1 + $0x8] sm:$0xff]  ;;  %v264_v16 = vld [vmem:[%s259_s10] sm:$0xff]  ;;  %s255_s10 = scalar_lea.vmem [#allocation2], %s557_s9  ;;  %s738_s9 = smov [#allocation2]  }
  0x19   : > { %611 = vmatpush3.msra.mxu1 %v278_v4  ;;  %591 = vmatprep.subr.mxu0 %v734_v1  ;;  %v265_v17 = vld [vmem:[%s940_s1] sm:$0xff]  ;;  %s482_s18 = sshll.u32 %s255_s10, 4  ;;  %s676_s25 = sshll.u32 %s738_s9, 4  ;;  %s483_s18 = int_to_ptr.vmem [resolvable:$true] %s482_s18  ;;  %s677_s25 = int_to_ptr.vmem [resolvable:$false] %s676_s25 }
  0x1a   : > { %612 = vmatprep.subr.mxu1 %v734_v1  ;;  %592 = vmatpush3.msra.mxu0 %v270_v6  ;;  %v562_v18 = vld [vmem:[%s943_s4] ss:$0 sm:$0xff]  ;;  %s672_s29 = scalar_lea.vmem %s483_s18, 128  ;;  %s678_s11 = scalar_lea.vmem %s677_s25, 256 }
  0x1b   : > { %613 = vmatpush3.msra.mxu1 %v277_v7  ;;  %593 = vmatprep.subr.mxu0 %v734_v1  ;;  %v560_v20 = vld [vmem:[%s942_s3] ss:$0 sm:$0xff]  ;;  %p673_p11 = scmp.ne.s32.totalorder %s483_s18, %s672_s29  ;;  %p679_p0 = scmp.lt.s32.totalorder %s483_s18, %s677_s25 }
  0x1c   : > { %614 = vmatprep.subr.mxu1 %v734_v1  ;;  %594 = vmatpush3.msra.mxu0 %v269_v8  ;;  %v451_v33 = vld [vmem:[%s263_s14] sm:$0xff]  ;;  %p680_p1 = scmp.lt.s32.totalorder %s678_s11, %s672_s29 }
  0x1d   : > { %615 = vmatpush3.msra.mxu1 %v276_v9  ;;  %595 = vmatprep.subr.mxu0 %v734_v1  ;;  %p674_p12 = pnand %p673_p11, %p812_p5 }
  0x1e   : > { %616 = vmatprep.subr.mxu1 %v734_v1  ;;  %596 = vmatpush3.msra.mxu0 %v268_v10  ;;  %p681_p2 = por %p680_p1, %p679_p0 }
  0x1f   : > { %617 = vmatpush3.msra.mxu1 %v275_v11  ;;  %597 = vmatprep.subr.mxu0 %v734_v1  ;;  %p675_p13 = pneg %p674_p12 }
  0x20   : > { %618 = vmatprep.subr.mxu1 %v734_v1  ;;  %598 = vmatpush3.msra.mxu0 %v267_v12 }
  0x21   : > { %619 = vmatpush3.msra.mxu1 %v274_v13  ;;  %599 = vmatprep.subr.mxu0 %v734_v1  ;;  %p682_p3 = pnand %p681_p2, %p675_p13 }
  0x22   : > { %620 = vmatprep.subr.mxu1 %v734_v1  ;;  %600 = vmatpush3.msra.mxu0 %v266_v14 }
  0x23   : > { %621 = vmatpush3.msra.mxu1 %v273_v15  ;;  %601 = vmatprep.subr.mxu0 %v734_v1 }
  0x24   : > { %623 = vmatmul.mubr.msk.f32.vlgmr.msra.gmra.mxu1 %vm288_vm1, %v264_v16  ;;  %602 = vmatpush3.msra.mxu0 %v265_v17 }
  0x25   : > { %603 = vmatprep.mubr.msk.f32.mxu0 %vm735_vm0, %v734_v1 }
  0x26   : > { %604 = vmatmul.mubr.msk.f32.vlgmr.msra.gmra.mxu0 %vm288_vm1, %v264_v16 }
  0xe4   : > { %v435_v19 = vpop.f32.mrf.mxu1 }
  0xe5   : > { %v436_v21 = vadd.f32 %v562_v18, %v435_v19 }
  0xe6   : > { %v624_v22 = vpop.f32.mrf.mxu1  ;;  %v358_v23 = vpop.f32.mrf.mxu0 }
  0xe7   : > { %vm442_vm2 = vcmp.ge.f32.partialorder %v436_v21, 0.0  ;;  %v443_v24 = vmul.f32 0.2, %v436_v21  ;;  %v359_v25 = vadd.f32 %v560_v20, %v358_v23 }
  0xe8   : > { %v605_v26 = vpop.f32.mrf.mxu0 }
  0xe9   : > { %v444_v27 = vsel %vm442_vm2, %v436_v21, %v443_v24  ;;  %vm439_vm3 = vcmp.ge.f32.partialorder %v359_v25, 0.0  ;;  %v440_v28 = vmul.f32 0.2, %v359_v25 }
  0xea   : > { %v564_v29 = vmul.f32 -1.442695, %v444_v27 }
  0xeb   : > { %v441_v30 = vsel %vm439_vm3, %v359_v25, %v440_v28 }
  0xec   : > { %668 = vpow2.f32 %v564_v29  ;;  %455 = vst.msk [vmem:[%s255_s10] sm:$0xff] %vm454_vm4, %v441_v30 }
  0xf9   : > { %v669_v31 = vpop.eup %668 }
  0xfa   : > { %v448_v32 = vadd.f32 1.0, %v669_v31 }
  0xfc   : > { %670 = vrcp.f32 %v448_v32 }
 0x109   : > { %v671_v34 = vpop.eup %670 }
 0x10a   : > { %457 = vrot.lane.b32.xlu0 %v671_v34, %s736_s15  ;;  %v452_v35 = vmul.f32 %v671_v34, %v451_v33 }
 0x10c   : > { %v453_v36 = vadd.f32 %v452_v35, %v441_v30 }
 0x10e   : > { %463 = vrot.lane.b32.xlu0 %v453_v36, %s737_s16 }
 0x17c   : > { %v458_v37 = vpop.permute.xlu0 %457 }
 0x17d   : > { %461 = vst.msk [vmem:[%s255_s10] sm:$0xff] %vm460_vm5, %v458_v37 }
 0x180   : > { %v464_v38 = vpop.permute.xlu0 %463 }
 0x181   : > { %467 = vst.msk [vmem:[%s255_s10] sm:$0xff] %vm466_vm6, %v464_v38 }
 0x182   : > { %685 = shalt.err (!%p682_p3)
}
 0x183   : > { %s686_s10 = scalar_lea.hbm %s902_s13, 128  ;;  %s690_s14 = scalar_lea.hbm %s945_s6, 512 }
 0x184   : > { %p687_p4 = scmp.ne.s32.totalorder %s902_s13, %s686_s10  ;;  %p691_p9 = scmp.lt.s32.totalorder %s902_s13, %s945_s6 }
 0x185   : > { %p692_p10 = scmp.lt.s32.totalorder %s690_s14, %s686_s10 }
 0x186   : > { %p688_p7 = pnand %p687_p4, %p812_p5 }
 0x187   : > { %p693_p11 = por %p692_p10, %p691_p9 }
 0x188   : > { %p689_p8 = pneg %p688_p7 }
 0x18a   : > { %p694_p12 = pnand %p693_p11, %p689_p8 }
 0x18c   : > { %697 = shalt.err (!%p694_p12)
}
 0x18d   : > { %625 = dma.vmem_to_hbm [thread:$0]  (%p812_p5), %s483_s18, 128, %s902_s13, %s469_s28  }
 0x18e PF: > { %p631_p13 = scmp.ge.s32.totalorder %s732_s24, 2  ;;  %s494_s17 = sand.u32 1, %s720_s21  }
 0x18f   : > { %s495_s19 = scalar_lea.sflag [#allocation3], %s494_s17 }
 0x190   : > { %p628_p0 = pnand %p631_p13, %p816_p6 }
 0x192   : > { %p629_p1 = pneg %p628_p0 }
 0x194   : > { %715 = dma.done.wait (%p629_p1), %s495_s19, 128  }
 0x195   : > { %717 = vsyncadd (%p629_p1), %s495_s19, 4294967168  ;;  %p16_p2 = scmp.ge.s32.totalorder %s799_s27, 6   ;;  %s948_s21 = smov %s724_s22 }
 0x196   : > { %s949_s22 = smov %s728_s23  ;;  %s950_s23 = smov %s810_s30 }
 0x197   : > { %s951_s24 = smov %s799_s27  ;;  %18 = sbr.rel (!%p16_p2) target bundleno = 3 (0x3), region = 82 }
 0x19c   :  { %500 = vsyncpa [#allocation3], 1 }
 0x19d   :  { %502 = vsyncpa [#allocation3 + $0x1], 1 }

</bundles_post_ra>
